<compile_context>
chip_gen: v5e
topology: v5e:2x2
jax: 0.10.0
libtpu: 0.0.40
codegen_flags: <defaults>
</compile_context>

<pallas_src>
import functools
import math

import jax
import jax.numpy as jnp
from jax.experimental import pallas as pl
from jax.experimental.pallas import tpu as pltpu

_EXP_NEG10 = math.exp(-10.0)
_AVE_EDGE, _AVE_MID = 1.0 / 3.0, 1.0 / 3.0   # aveKernal = [1,1,1]/3 (x) [1,1,1]/3
_GAU_EDGE, _GAU_MID = 1.0 / 4.0, 1.0 / 2.0   # gauKernal = [1,2,1]/4 (x) [1,2,1]/4
_LANES = 128


def _edge_masks(h, wp, w_true):
    """Hoisted boundary / validity masks, built once per kernel and reused."""
    col = jax.lax.broadcasted_iota(jnp.int32, (1, 1, wp), 2)
    row = jax.lax.broadcasted_iota(jnp.int32, (1, h, 1), 1)
    w_lo = col >= 1                  # may read column j-1
    w_hi = col < (w_true - 1)        # may read column j+1 (zero pad at *true* W)
    h_lo = row >= 1
    h_hi = row < (h - 1)
    valid = col < w_true             # true-image lanes (excludes lane padding)
    return w_lo, w_hi, h_lo, h_hi, valid


def _sep_conv3(x, edge, mid, w_lo, w_hi, h_lo, h_hi):
    """Separable symmetric 3x3 conv, taps [edge, mid, edge] per axis, zero pad=1.

    pltpu.roll follows the jnp.roll convention (result[i] = x[(i - shift) % n]),
    so shift = n-1 yields x[i+1] and shift = 1 yields x[i-1]; the hoisted masks
    zero the wrapped / out-of-true-image entries (conv zero padding).
    """
    e = jnp.float32(edge)
    m = jnp.float32(mid)
    zero = jnp.float32(0.0)
    wa = x.ndim - 1
    ha = x.ndim - 2
    wn = x.shape[wa]
    hn = x.shape[ha]
    # lane (W) pass
    plus = jnp.where(w_hi, pltpu.roll(x, shift=wn - 1, axis=wa), zero)
    minus = jnp.where(w_lo, pltpu.roll(x, shift=1, axis=wa), zero)
    z = m * x + e * (plus + minus)
    # sublane (H) pass
    plus = jnp.where(h_hi, pltpu.roll(z, shift=hn - 1, axis=ha), zero)
    minus = jnp.where(h_lo, pltpu.roll(z, shift=1, axis=ha), zero)
    return m * z + e * (plus + minus)


def _sum_hw(y):
    """Sum over the last two (H, W) dims, keepdims, via two 1-axis reductions."""
    return jnp.sum(jnp.sum(y, axis=-1, keepdims=True), axis=-2, keepdims=True)


def _spectral_kernel(fr_ref, fi_ref, gr_ref, gi_ref, *, w_true):
    """log-amplitude spectral residual on separate (real, imag) FFT planes."""
    fr = fr_ref[...]                                    # (Bblk, H, Wp)
    fi = fi_ref[...]
    h, wp = fr.shape[-2], fr.shape[-1]
    w_lo, w_hi, h_lo, h_hi, _ = _edge_masks(h, wp, w_true)

    p = fr * fr + fi * fi
    nz = p > jnp.float32(0.0)
    inv = jax.lax.rsqrt(jnp.where(nz, p, jnp.float32(1.0)))     # 1/|F| (guarded)
    norm = p * inv                                              # |F| (0 where F == 0)
    log_amp = jnp.log(norm + jnp.float32(_EXP_NEG10))           # log(abs(fft)+exp(-10))
    amp_filter = _sep_conv3(log_amp, _AVE_EDGE, _AVE_MID, w_lo, w_hi, h_lo, h_hi)
    mag = jnp.exp(log_amp - amp_filter)                         # exp(amp_sr)
    gr_ref[...] = mag * jnp.where(nz, fr * inv, jnp.float32(1.0))   # cos(angle); angle(0)=0
    gi_ref[...] = mag * jnp.where(nz, fi * inv, jnp.float32(0.0))   # sin(angle)


def _spatial_kernel(sr_ref, x1_ref, w_ref, b_ref, gamma_ref, beta_ref, out_ref, *,
                    w_true):
    """|ifft| -> gaussian 3x3 -> 1x1 conv (2->3) -> BN(train, per-sample) -> ReLU."""
    sr = sr_ref[...]                                    # (Bblk, H, Wp) = abs(ifftn)
    x1 = x1_ref[...]
    h, wp = sr.shape[-2], sr.shape[-1]
    w_lo, w_hi, h_lo, h_hi, valid = _edge_masks(h, wp, w_true)
    inv_n = jnp.float32(1.0 / (h * w_true))             # biased stats over true H*W
    zero = jnp.float32(0.0)

    sr_g = _sep_conv3(sr, _GAU_EDGE, _GAU_MID, w_lo, w_hi, h_lo, h_hi)   # gaussi conv

    for c in range(3):                                  # unrolled at trace time
        # output_conv: 1x1 conv over channels cat([SR, x1])
        y = w_ref[2 * c] * sr_g + w_ref[2 * c + 1] * x1 + b_ref[c]
        # BatchNorm2d (training mode, applied one sample at a time as in the
        # reference loop): two-pass biased stats over the true H*W, eps=1e-5.
        mean = _sum_hw(jnp.where(valid, y, zero)) * inv_n
        d = jnp.where(valid, y - mean, zero)
        var = _sum_hw(d * d) * inv_n
        scale = gamma_ref[c] * jax.lax.rsqrt(var + jnp.float32(1e-5))
        out_ref[:, c] = jnp.maximum(scale * (y - mean) + beta_ref[c], zero)


def _vmem_limit_bytes():
    """Generation-aware scoped-VMEM limit: ~96 MiB on v5e/v6e (128 MiB
    physical), ~48 MiB on v7x (64 MiB per TensorCore)."""
    cap = 64 << 20
    try:
        info = pltpu.get_tpu_info()
        cap = int(getattr(info, "vmem_capacity_bytes", cap) or cap)
    except Exception:
        pass
    return max(16 << 20, min(96 << 20, (cap * 3) // 4))


def _pick_batch_block(B, H, Wp, vmem_limit):
    """Batch elements per grid step: amortize ~0.35us/step grid overhead while
    the double-buffered in/out blocks of both kernels plus in-kernel
    temporaries (~24 f32 (H, Wp) planes per sample, conservative) stay inside
    the scoped VMEM limit, and the grid keeps >= 2 (pref. 4) steps so v7x's two
    TensorCores can split the "parallel" batch axis."""
    plane_bytes = H * Wp * 4
    budget = (vmem_limit * 3) // 4
    bblk = max(1, min(B, budget // (24 * plane_bytes)))
    bblk = min(bblk, max(1, pl.cdiv(B, 4)))     # keep grid length >= 2 (v7x megacore)
    while B % bblk:                             # exact grid: no padded partial blocks
        bblk -= 1
    # TODO(synk): when a single-sample block no longer fits the budget (very
    # large H*W, v7x first), tile along H with a 1-row halo (spectral) and a
    # two-phase accumulate/finalize BN (spatial) instead of relying on bblk=1.
    return bblk


def srlayer_forward(x, w, b, gamma, beta):
    B, _, H, W = x.shape
    x1 = x[:, 0, :, :].astype(jnp.float32)                       # (B, H, W)

    # TODO(synk): torch.fft.fftn/ifftn have no Pallas primitive; XLA FFT glue.
    F = jnp.fft.fftn(x1, axes=(-2, -1))                          # complex64

    Wp = ((W + _LANES - 1) // _LANES) * _LANES                   # lane-dense width

    def pad_w(a):
        if a.shape[-1] == Wp:
            return a
        cfg = [(0, 0)] * (a.ndim - 1) + [(0, Wp - a.shape[-1])]
        return jnp.pad(a, cfg)

    vmem_limit = _vmem_limit_bytes()
    bblk = _pick_batch_block(B, H, Wp, vmem_limit)
    grid = (B // bblk,)
    params = pltpu.CompilerParams(dimension_semantics=("parallel",),
                                  vmem_limit_bytes=vmem_limit)

    plane = pl.BlockSpec((bblk, H, Wp), lambda i: (i, 0, 0))
    smem = pl.BlockSpec(memory_space=pltpu.SMEM)

    g_re, g_im = pl.pallas_call(
        functools.partial(_spectral_kernel, w_true=W),
        out_shape=(jax.ShapeDtypeStruct((B, H, Wp), jnp.float32),
                   jax.ShapeDtypeStruct((B, H, Wp), jnp.float32)),
        grid=grid,
        in_specs=[plane, plane],
        out_specs=(plane, plane),
        compiler_params=params,
    )(pad_w(jnp.real(F).astype(jnp.float32)),
      pad_w(jnp.imag(F).astype(jnp.float32)))

    G = jnp.fft.ifftn(jax.lax.complex(g_re[..., :W], g_im[..., :W]), axes=(-2, -1))
    sr = jnp.abs(G).astype(jnp.float32)                          # abs(ifftn) in wrapper

    out_p = pl.pallas_call(
        functools.partial(_spatial_kernel, w_true=W),
        out_shape=jax.ShapeDtypeStruct((B, 3, H, Wp), jnp.float32),
        grid=grid,
        in_specs=[plane, plane, smem, smem, smem, smem],
        out_specs=pl.BlockSpec((bblk, 3, H, Wp), lambda i: (i, 0, 0, 0)),
        compiler_params=params,
    )(pad_w(sr), pad_w(x1),
      w.reshape(-1).astype(jnp.float32), b.astype(jnp.float32),
      gamma.astype(jnp.float32), beta.astype(jnp.float32))
    return out_p[..., :W]


if __name__ == "__main__":
    key = jax.random.PRNGKey(0)
    kx, kw, kb = jax.random.split(key, 3)

    B, C, H, W = 2, 4, 16, 16          # module constructed with channel=1
    x = jax.random.normal(kx, (B, C, H, W), dtype=jnp.float32)

    # output_conv = Conv2d(2, 3, k=1); kaiming_normal(mode='fan_out', relu):
    # fan_out = 3*1*1 -> std = sqrt(2/3).  Bias ~ U(-1/sqrt(2), 1/sqrt(2)).
    w = jax.random.normal(kw, (3, 2), dtype=jnp.float32) * jnp.float32(math.sqrt(2.0 / 3.0))
    b = jax.random.uniform(kb, (3,), dtype=jnp.float32,
                           minval=-1.0 / math.sqrt(2.0), maxval=1.0 / math.sqrt(2.0))
    gamma = jnp.ones((3,), jnp.float32)    # BatchNorm2d(3) weight
    beta = jnp.zeros((3,), jnp.float32)    # BatchNorm2d(3) bias

    y = jax.jit(srlayer_forward)(x, w, b, gamma, beta)
    y = jax.block_until_ready(y)
    assert y.shape == (B, 3, H, W)
    assert bool(jnp.all(jnp.isfinite(y)))
    print("KERNEL_OK")
</pallas_src>

<mosaic_0001>
module attributes {stable_mosaic.version = 11 : i64} {
  func.func @_spectral_kernel(%arg0: i32, %arg1: memref<1x16x128xf32, #tpu.memory_space<vmem>>, %arg2: memref<1x16x128xf32, #tpu.memory_space<vmem>>, %arg3: memref<1x16x128xf32, #tpu.memory_space<vmem>>, %arg4: memref<1x16x128xf32, #tpu.memory_space<vmem>>) attributes {dimension_semantics = [#tpu.dimension_semantics<parallel>], iteration_bounds = array<i64: 2>, scalar_prefetch = 0 : i64, scratch_operands = 0 : i64, tpu.core_type = #tpu.core_type<tc>, window_params = [{transform_indices = @transform_0, window_bounds = array<i64: 1, 16, 128>}, {transform_indices = @transform_1, window_bounds = array<i64: 1, 16, 128>}, {transform_indices = @transform_2, window_bounds = array<i64: 1, 16, 128>}, {transform_indices = @transform_3, window_bounds = array<i64: 1, 16, 128>}]} {
    %c0 = arith.constant 0 : index
    %c0_0 = arith.constant 0 : index
    %c0_1 = arith.constant 0 : index
    %0 = vector.load %arg1[%c0, %c0_0, %c0_1] : memref<1x16x128xf32, #tpu.memory_space<vmem>>, vector<1x16x128xf32>
    %c0_2 = arith.constant 0 : index
    %c0_3 = arith.constant 0 : index
    %c0_4 = arith.constant 0 : index
    %1 = vector.load %arg2[%c0_2, %c0_3, %c0_4] : memref<1x16x128xf32, #tpu.memory_space<vmem>>, vector<1x16x128xf32>
    %2 = tpu.iota {dimensions = array<i32: 2>} : vector<1x1x128xi32>
    %3 = tpu.iota {dimensions = array<i32: 1>} : vector<1x16x1xi32>
    %c1_i32 = arith.constant 1 : i32
    %4 = vector.broadcast %c1_i32 : i32 to vector<1x1x128xi32>
    %5 = arith.cmpi sge, %2, %4 : vector<1x1x128xi32>
    %c15_i32 = arith.constant 15 : i32
    %6 = vector.broadcast %c15_i32 : i32 to vector<1x1x128xi32>
    %7 = arith.cmpi slt, %2, %6 : vector<1x1x128xi32>
    %c1_i32_5 = arith.constant 1 : i32
    %8 = vector.broadcast %c1_i32_5 : i32 to vector<1x16x1xi32>
    %9 = arith.cmpi sge, %3, %8 : vector<1x16x1xi32>
    %c15_i32_6 = arith.constant 15 : i32
    %10 = vector.broadcast %c15_i32_6 : i32 to vector<1x16x1xi32>
    %11 = arith.cmpi slt, %3, %10 : vector<1x16x1xi32>
    %12 = arith.mulf %0, %0 : vector<1x16x128xf32>
    %13 = arith.mulf %1, %1 : vector<1x16x128xf32>
    %14 = arith.addf %12, %13 : vector<1x16x128xf32>
    %cst = arith.constant 0.000000e+00 : f32
    %15 = vector.broadcast %cst : f32 to vector<1x16x128xf32>
    %16 = arith.cmpf ogt, %14, %15 : vector<1x16x128xf32>
    %cst_7 = arith.constant 1.000000e+00 : f32
    %17 = vector.broadcast %cst_7 : f32 to vector<1x16x128xf32>
    %18 = arith.select %16, %14, %17 : vector<1x16x128xi1>, vector<1x16x128xf32>
    %19 = math.rsqrt %18 : vector<1x16x128xf32>
    %20 = arith.mulf %14, %19 : vector<1x16x128xf32>
    %cst_8 = arith.constant 4.5399931E-5 : f32
    %21 = vector.broadcast %cst_8 : f32 to vector<1x16x128xf32>
    %22 = arith.addf %20, %21 : vector<1x16x128xf32>
    %23 = math.log %22 : vector<1x16x128xf32>
    %c127_i32 = arith.constant 127 : i32
    %24 = tpu.dynamic_rotate %23 by %c127_i32 dim 2 : vector<1x16x128xf32>, i32 -> vector<1x16x128xf32>
    %cst_9 = arith.constant 0.000000e+00 : f32
    %25 = vector.shape_cast %7 : vector<1x1x128xi1> to vector<1x1x128xi1>
    %26 = vector.broadcast %25 : vector<1x1x128xi1> to vector<1x16x128xi1>
    %27 = vector.broadcast %cst_9 : f32 to vector<1x16x128xf32>
    %28 = arith.select %26, %24, %27 : vector<1x16x128xi1>, vector<1x16x128xf32>
    %c1_i32_10 = arith.constant 1 : i32
    %29 = tpu.dynamic_rotate %23 by %c1_i32_10 dim 2 : vector<1x16x128xf32>, i32 -> vector<1x16x128xf32>
    %cst_11 = arith.constant 0.000000e+00 : f32
    %30 = vector.shape_cast %5 : vector<1x1x128xi1> to vector<1x1x128xi1>
    %31 = vector.broadcast %30 : vector<1x1x128xi1> to vector<1x16x128xi1>
    %32 = vector.broadcast %cst_11 : f32 to vector<1x16x128xf32>
    %33 = arith.select %31, %29, %32 : vector<1x16x128xi1>, vector<1x16x128xf32>
    %cst_12 = arith.constant 0.333333343 : f32
    %34 = vector.broadcast %cst_12 : f32 to vector<1x16x128xf32>
    %35 = arith.mulf %34, %23 : vector<1x16x128xf32>
    %36 = arith.addf %28, %33 : vector<1x16x128xf32>
    %cst_13 = arith.constant 0.333333343 : f32
    %37 = vector.broadcast %cst_13 : f32 to vector<1x16x128xf32>
    %38 = arith.mulf %37, %36 : vector<1x16x128xf32>
    %39 = arith.addf %35, %38 : vector<1x16x128xf32>
    %c15_i32_14 = arith.constant 15 : i32
    %40 = tpu.dynamic_rotate %39 by %c15_i32_14 dim 1 : vector<1x16x128xf32>, i32 -> vector<1x16x128xf32>
    %cst_15 = arith.constant 0.000000e+00 : f32
    %41 = vector.shape_cast %11 : vector<1x16x1xi1> to vector<1x16x1xi1>
    %42 = vector.broadcast %41 : vector<1x16x1xi1> to vector<1x16x128xi1>
    %43 = vector.broadcast %cst_15 : f32 to vector<1x16x128xf32>
    %44 = arith.select %42, %40, %43 : vector<1x16x128xi1>, vector<1x16x128xf32>
    %c1_i32_16 = arith.constant 1 : i32
    %45 = tpu.dynamic_rotate %39 by %c1_i32_16 dim 1 : vector<1x16x128xf32>, i32 -> vector<1x16x128xf32>
    %cst_17 = arith.constant 0.000000e+00 : f32
    %46 = vector.shape_cast %9 : vector<1x16x1xi1> to vector<1x16x1xi1>
    %47 = vector.broadcast %46 : vector<1x16x1xi1> to vector<1x16x128xi1>
    %48 = vector.broadcast %cst_17 : f32 to vector<1x16x128xf32>
    %49 = arith.select %47, %45, %48 : vector<1x16x128xi1>, vector<1x16x128xf32>
    %cst_18 = arith.constant 0.333333343 : f32
    %50 = vector.broadcast %cst_18 : f32 to vector<1x16x128xf32>
    %51 = arith.mulf %50, %39 : vector<1x16x128xf32>
    %52 = arith.addf %44, %49 : vector<1x16x128xf32>
    %cst_19 = arith.constant 0.333333343 : f32
    %53 = vector.broadcast %cst_19 : f32 to vector<1x16x128xf32>
    %54 = arith.mulf %53, %52 : vector<1x16x128xf32>
    %55 = arith.addf %51, %54 : vector<1x16x128xf32>
    %56 = arith.subf %23, %55 : vector<1x16x128xf32>
    %57 = math.exp %56 : vector<1x16x128xf32>
    %58 = arith.mulf %0, %19 : vector<1x16x128xf32>
    %cst_20 = arith.constant 1.000000e+00 : f32
    %59 = vector.broadcast %cst_20 : f32 to vector<1x16x128xf32>
    %60 = arith.select %16, %58, %59 : vector<1x16x128xi1>, vector<1x16x128xf32>
    %61 = arith.mulf %57, %60 : vector<1x16x128xf32>
    %c0_21 = arith.constant 0 : index
    %c0_22 = arith.constant 0 : index
    %c0_23 = arith.constant 0 : index
    %62 = vector.load %arg3[%c0_21, %c0_22, %c0_23] : memref<1x16x128xf32, #tpu.memory_space<vmem>>, vector<1x16x128xf32>
    tpu.vector_store %arg3[%c0_21, %c0_22, %c0_23], %61 {strides = array<i32>} : memref<1x16x128xf32, #tpu.memory_space<vmem>>, vector<1x16x128xf32>,
    %63 = arith.mulf %1, %19 : vector<1x16x128xf32>
    %cst_24 = arith.constant 0.000000e+00 : f32
    %64 = vector.broadcast %cst_24 : f32 to vector<1x16x128xf32>
    %65 = arith.select %16, %63, %64 : vector<1x16x128xi1>, vector<1x16x128xf32>
    %66 = arith.mulf %57, %65 : vector<1x16x128xf32>
    %c0_25 = arith.constant 0 : index
    %c0_26 = arith.constant 0 : index
    %c0_27 = arith.constant 0 : index
    %67 = vector.load %arg4[%c0_25, %c0_26, %c0_27] : memref<1x16x128xf32, #tpu.memory_space<vmem>>, vector<1x16x128xf32>
    tpu.vector_store %arg4[%c0_25, %c0_26, %c0_27], %66 {strides = array<i32>} : memref<1x16x128xf32, #tpu.memory_space<vmem>>, vector<1x16x128xf32>,
    return
  }
  func.func @transform_0(%arg0: i32) -> (i32, i32, i32) {
    %c0_i32 = arith.constant 0 : i32
    %c0_i32_0 = arith.constant 0 : i32
    %c0_i32_1 = arith.constant 0 : i32
    return %arg0, %c0_i32, %c0_i32_0 : i32, i32, i32
  }
  func.func @transform_1(%arg0: i32) -> (i32, i32, i32) {
    %c0_i32 = arith.constant 0 : i32
    %c0_i32_0 = arith.constant 0 : i32
    %c0_i32_1 = arith.constant 0 : i32
    return %arg0, %c0_i32, %c0_i32_0 : i32, i32, i32
  }
  func.func @transform_2(%arg0: i32) -> (i32, i32, i32) {
    %c0_i32 = arith.constant 0 : i32
    %c0_i32_0 = arith.constant 0 : i32
    %c0_i32_1 = arith.constant 0 : i32
    return %arg0, %c0_i32, %c0_i32_0 : i32, i32, i32
  }
  func.func @transform_3(%arg0: i32) -> (i32, i32, i32) {
    %c0_i32 = arith.constant 0 : i32
    %c0_i32_0 = arith.constant 0 : i32
    %c0_i32_1 = arith.constant 0 : i32
    return %arg0, %c0_i32, %c0_i32_0 : i32, i32, i32
  }
}

module attributes {stable_mosaic.version = 11 : i64} {
  func.func @_spatial_kernel(%arg0: i32, %arg1: memref<1x16x128xf32, #tpu.memory_space<vmem>>, %arg2: memref<1x16x128xf32, #tpu.memory_space<vmem>>, %arg3: memref<6xf32, #tpu.memory_space<smem>>, %arg4: memref<3xf32, #tpu.memory_space<smem>>, %arg5: memref<3xf32, #tpu.memory_space<smem>>, %arg6: memref<3xf32, #tpu.memory_space<smem>>, %arg7: memref<1x3x16x128xf32, #tpu.memory_space<vmem>>) attributes {dimension_semantics = [#tpu.dimension_semantics<parallel>], iteration_bounds = array<i64: 2>, scalar_prefetch = 0 : i64, scratch_operands = 0 : i64, tpu.core_type = #tpu.core_type<tc>, window_params = [{transform_indices = @transform_0, window_bounds = array<i64: 1, 16, 128>}, {transform_indices = @transform_1, window_bounds = array<i64: 1, 16, 128>}, {transform_indices = @transform_2, window_bounds = array<i64: 6>}, {transform_indices = @transform_3, window_bounds = array<i64: 3>}, {transform_indices = @transform_4, window_bounds = array<i64: 3>}, {transform_indices = @transform_5, window_bounds = array<i64: 3>}, {transform_indices = @transform_6, window_bounds = array<i64: 1, 3, 16, 128>}]} {
    %c0 = arith.constant 0 : index
    %c0_0 = arith.constant 0 : index
    %c0_1 = arith.constant 0 : index
    %0 = vector.load %arg1[%c0, %c0_0, %c0_1] : memref<1x16x128xf32, #tpu.memory_space<vmem>>, vector<1x16x128xf32>
    %c0_2 = arith.constant 0 : index
    %c0_3 = arith.constant 0 : index
    %c0_4 = arith.constant 0 : index
    %1 = vector.load %arg2[%c0_2, %c0_3, %c0_4] : memref<1x16x128xf32, #tpu.memory_space<vmem>>, vector<1x16x128xf32>
    %2 = tpu.iota {dimensions = array<i32: 2>} : vector<1x1x128xi32>
    %3 = tpu.iota {dimensions = array<i32: 1>} : vector<1x16x1xi32>
    %c1_i32 = arith.constant 1 : i32
    %4 = vector.broadcast %c1_i32 : i32 to vector<1x1x128xi32>
    %5 = arith.cmpi sge, %2, %4 : vector<1x1x128xi32>
    %c15_i32 = arith.constant 15 : i32
    %6 = vector.broadcast %c15_i32 : i32 to vector<1x1x128xi32>
    %7 = arith.cmpi slt, %2, %6 : vector<1x1x128xi32>
    %c1_i32_5 = arith.constant 1 : i32
    %8 = vector.broadcast %c1_i32_5 : i32 to vector<1x16x1xi32>
    %9 = arith.cmpi sge, %3, %8 : vector<1x16x1xi32>
    %c15_i32_6 = arith.constant 15 : i32
    %10 = vector.broadcast %c15_i32_6 : i32 to vector<1x16x1xi32>
    %11 = arith.cmpi slt, %3, %10 : vector<1x16x1xi32>
    %c16_i32 = arith.constant 16 : i32
    %12 = vector.broadcast %c16_i32 : i32 to vector<1x1x128xi32>
    %13 = arith.cmpi slt, %2, %12 : vector<1x1x128xi32>
    %c127_i32 = arith.constant 127 : i32
    %14 = tpu.dynamic_rotate %0 by %c127_i32 dim 2 : vector<1x16x128xf32>, i32 -> vector<1x16x128xf32>
    %cst = arith.constant 0.000000e+00 : f32
    %15 = vector.shape_cast %7 : vector<1x1x128xi1> to vector<1x1x128xi1>
    %16 = vector.broadcast %15 : vector<1x1x128xi1> to vector<1x16x128xi1>
    %17 = vector.broadcast %cst : f32 to vector<1x16x128xf32>
    %18 = arith.select %16, %14, %17 : vector<1x16x128xi1>, vector<1x16x128xf32>
    %c1_i32_7 = arith.constant 1 : i32
    %19 = tpu.dynamic_rotate %0 by %c1_i32_7 dim 2 : vector<1x16x128xf32>, i32 -> vector<1x16x128xf32>
    %cst_8 = arith.constant 0.000000e+00 : f32
    %20 = vector.shape_cast %5 : vector<1x1x128xi1> to vector<1x1x128xi1>
    %21 = vector.broadcast %20 : vector<1x1x128xi1> to vector<1x16x128xi1>
    %22 = vector.broadcast %cst_8 : f32 to vector<1x16x128xf32>
    %23 = arith.select %21, %19, %22 : vector<1x16x128xi1>, vector<1x16x128xf32>
    %cst_9 = arith.constant 5.000000e-01 : f32
    %24 = vector.broadcast %cst_9 : f32 to vector<1x16x128xf32>
    %25 = arith.mulf %24, %0 : vector<1x16x128xf32>
    %26 = arith.addf %18, %23 : vector<1x16x128xf32>
    %cst_10 = arith.constant 2.500000e-01 : f32
    %27 = vector.broadcast %cst_10 : f32 to vector<1x16x128xf32>
    %28 = arith.mulf %27, %26 : vector<1x16x128xf32>
    %29 = arith.addf %25, %28 : vector<1x16x128xf32>
    %c15_i32_11 = arith.constant 15 : i32
    %30 = tpu.dynamic_rotate %29 by %c15_i32_11 dim 1 : vector<1x16x128xf32>, i32 -> vector<1x16x128xf32>
    %cst_12 = arith.constant 0.000000e+00 : f32
    %31 = vector.shape_cast %11 : vector<1x16x1xi1> to vector<1x16x1xi1>
    %32 = vector.broadcast %31 : vector<1x16x1xi1> to vector<1x16x128xi1>
    %33 = vector.broadcast %cst_12 : f32 to vector<1x16x128xf32>
    %34 = arith.select %32, %30, %33 : vector<1x16x128xi1>, vector<1x16x128xf32>
    %c1_i32_13 = arith.constant 1 : i32
    %35 = tpu.dynamic_rotate %29 by %c1_i32_13 dim 1 : vector<1x16x128xf32>, i32 -> vector<1x16x128xf32>
    %cst_14 = arith.constant 0.000000e+00 : f32
    %36 = vector.shape_cast %9 : vector<1x16x1xi1> to vector<1x16x1xi1>
    %37 = vector.broadcast %36 : vector<1x16x1xi1> to vector<1x16x128xi1>
    %38 = vector.broadcast %cst_14 : f32 to vector<1x16x128xf32>
    %39 = arith.select %37, %35, %38 : vector<1x16x128xi1>, vector<1x16x128xf32>
    %cst_15 = arith.constant 5.000000e-01 : f32
    %40 = vector.broadcast %cst_15 : f32 to vector<1x16x128xf32>
    %41 = arith.mulf %40, %29 : vector<1x16x128xf32>
    %42 = arith.addf %34, %39 : vector<1x16x128xf32>
    %cst_16 = arith.constant 2.500000e-01 : f32
    %43 = vector.broadcast %cst_16 : f32 to vector<1x16x128xf32>
    %44 = arith.mulf %43, %42 : vector<1x16x128xf32>
    %45 = arith.addf %41, %44 : vector<1x16x128xf32>
    %c0_17 = arith.constant 0 : index
    %46 = memref.load %arg3[%c0_17] : memref<6xf32, #tpu.memory_space<smem>>
    %47 = vector.broadcast %46 : f32 to vector<1x16x128xf32>
    %48 = arith.mulf %47, %45 : vector<1x16x128xf32>
    %c1 = arith.constant 1 : index
    %49 = memref.load %arg3[%c1] : memref<6xf32, #tpu.memory_space<smem>>
    %50 = vector.broadcast %49 : f32 to vector<1x16x128xf32>
    %51 = arith.mulf %50, %1 : vector<1x16x128xf32>
    %52 = arith.addf %48, %51 : vector<1x16x128xf32>
    %c0_18 = arith.constant 0 : index
    %53 = memref.load %arg4[%c0_18] : memref<3xf32, #tpu.memory_space<smem>>
    %54 = vector.broadcast %53 : f32 to vector<1x16x128xf32>
    %55 = arith.addf %52, %54 : vector<1x16x128xf32>
    %cst_19 = arith.constant 0.000000e+00 : f32
    %56 = vector.shape_cast %13 : vector<1x1x128xi1> to vector<1x1x128xi1>
    %57 = vector.broadcast %56 : vector<1x1x128xi1> to vector<1x16x128xi1>
    %58 = vector.broadcast %cst_19 : f32 to vector<1x16x128xf32>
    %59 = arith.select %57, %55, %58 : vector<1x16x128xi1>, vector<1x16x128xf32>
    %cst_20 = arith.constant dense<0.000000e+00> : vector<1x16xf32>
    %60 = vector.multi_reduction <add>, %59, %cst_20 [2] : vector<1x16x128xf32> to vector<1x16xf32>
    %61 = vector.shape_cast %60 : vector<1x16xf32> to vector<1x16x1xf32>
    %cst_21 = arith.constant dense<0.000000e+00> : vector<1x1xf32>
    %62 = vector.multi_reduction <add>, %61, %cst_21 [1] : vector<1x16x1xf32> to vector<1x1xf32>
    %63 = vector.shape_cast %62 : vector<1x1xf32> to vector<1x1x1xf32>
    %cst_22 = arith.constant 3.906250e-03 : f32
    %64 = vector.broadcast %cst_22 : f32 to vector<1x1x1xf32>
    %65 = arith.mulf %63, %64 : vector<1x1x1xf32>
    %66 = vector.broadcast %65 : vector<1x1x1xf32> to vector<1x16x128xf32>
    %67 = arith.subf %55, %66 : vector<1x16x128xf32>
    %cst_23 = arith.constant 0.000000e+00 : f32
    %68 = vector.shape_cast %13 : vector<1x1x128xi1> to vector<1x1x128xi1>
    %69 = vector.broadcast %68 : vector<1x1x128xi1> to vector<1x16x128xi1>
    %70 = vector.broadcast %cst_23 : f32 to vector<1x16x128xf32>
    %71 = arith.select %69, %67, %70 : vector<1x16x128xi1>, vector<1x16x128xf32>
    %72 = arith.mulf %71, %71 : vector<1x16x128xf32>
    %cst_24 = arith.constant dense<0.000000e+00> : vector<1x16xf32>
    %73 = vector.multi_reduction <add>, %72, %cst_24 [2] : vector<1x16x128xf32> to vector<1x16xf32>
    %74 = vector.shape_cast %73 : vector<1x16xf32> to vector<1x16x1xf32>
    %cst_25 = arith.constant dense<0.000000e+00> : vector<1x1xf32>
    %75 = vector.multi_reduction <add>, %74, %cst_25 [1] : vector<1x16x1xf32> to vector<1x1xf32>
    %76 = vector.shape_cast %75 : vector<1x1xf32> to vector<1x1x1xf32>
    %cst_26 = arith.constant 3.906250e-03 : f32
    %77 = vector.broadcast %cst_26 : f32 to vector<1x1x1xf32>
    %78 = arith.mulf %76, %77 : vector<1x1x1xf32>
    %c0_27 = arith.constant 0 : index
    %79 = memref.load %arg5[%c0_27] : memref<3xf32, #tpu.memory_space<smem>>
    %cst_28 = arith.constant 9.99999974E-6 : f32
    %80 = vector.broadcast %cst_28 : f32 to vector<1x1x1xf32>
    %81 = arith.addf %78, %80 : vector<1x1x1xf32>
    %82 = math.rsqrt %81 : vector<1x1x1xf32>
    %83 = vector.broadcast %79 : f32 to vector<1x1x1xf32>
    %84 = arith.mulf %83, %82 : vector<1x1x1xf32>
    %85 = vector.broadcast %65 : vector<1x1x1xf32> to vector<1x16x128xf32>
    %86 = arith.subf %55, %85 : vector<1x16x128xf32>
    %87 = vector.broadcast %84 : vector<1x1x1xf32> to vector<1x16x128xf32>
    %88 = arith.mulf %87, %86 : vector<1x16x128xf32>
    %c0_29 = arith.constant 0 : index
    %89 = memref.load %arg6[%c0_29] : memref<3xf32, #tpu.memory_space<smem>>
    %90 = vector.broadcast %89 : f32 to vector<1x16x128xf32>
    %91 = arith.addf %88, %90 : vector<1x16x128xf32>
    %cst_30 = arith.constant 0.000000e+00 : f32
    %92 = vector.broadcast %cst_30 : f32 to vector<1x16x128xf32>
    %93 = arith.maximumf %91, %92 : vector<1x16x128xf32>
    %c0_31 = arith.constant 0 : index
    %c0_32 = arith.constant 0 : index
    %c0_33 = arith.constant 0 : index
    %c0_34 = arith.constant 0 : index
    %94 = vector.load %arg7[%c0_31, %c0_32, %c0_33, %c0_34] : memref<1x3x16x128xf32, #tpu.memory_space<vmem>>, vector<1x1x16x128xf32>
    %95 = vector.shape_cast %94 : vector<1x1x16x128xf32> to vector<1x16x128xf32>
    %96 = vector.shape_cast %93 : vector<1x16x128xf32> to vector<1x1x16x128xf32>
    tpu.vector_store %arg7[%c0_31, %c0_32, %c0_33, %c0_34], %96 {strides = array<i32>} : memref<1x3x16x128xf32, #tpu.memory_space<vmem>>, vector<1x1x16x128xf32>,
    %c2 = arith.constant 2 : index
    %97 = memref.load %arg3[%c2] : memref<6xf32, #tpu.memory_space<smem>>
    %98 = vector.broadcast %97 : f32 to vector<1x16x128xf32>
    %99 = arith.mulf %98, %45 : vector<1x16x128xf32>
    %c3 = arith.constant 3 : index
    %100 = memref.load %arg3[%c3] : memref<6xf32, #tpu.memory_space<smem>>
    %101 = vector.broadcast %100 : f32 to vector<1x16x128xf32>
    %102 = arith.mulf %101, %1 : vector<1x16x128xf32>
    %103 = arith.addf %99, %102 : vector<1x16x128xf32>
    %c1_35 = arith.constant 1 : index
    %104 = memref.load %arg4[%c1_35] : memref<3xf32, #tpu.memory_space<smem>>
    %105 = vector.broadcast %104 : f32 to vector<1x16x128xf32>
    %106 = arith.addf %103, %105 : vector<1x16x128xf32>
    %cst_36 = arith.constant 0.000000e+00 : f32
    %107 = vector.shape_cast %13 : vector<1x1x128xi1> to vector<1x1x128xi1>
    %108 = vector.broadcast %107 : vector<1x1x128xi1> to vector<1x16x128xi1>
    %109 = vector.broadcast %cst_36 : f32 to vector<1x16x128xf32>
    %110 = arith.select %108, %106, %109 : vector<1x16x128xi1>, vector<1x16x128xf32>
    %cst_37 = arith.constant dense<0.000000e+00> : vector<1x16xf32>
    %111 = vector.multi_reduction <add>, %110, %cst_37 [2] : vector<1x16x128xf32> to vector<1x16xf32>
    %112 = vector.shape_cast %111 : vector<1x16xf32> to vector<1x16x1xf32>
    %cst_38 = arith.constant dense<0.000000e+00> : vector<1x1xf32>
    %113 = vector.multi_reduction <add>, %112, %cst_38 [1] : vector<1x16x1xf32> to vector<1x1xf32>
    %114 = vector.shape_cast %113 : vector<1x1xf32> to vector<1x1x1xf32>
    %cst_39 = arith.constant 3.906250e-03 : f32
    %115 = vector.broadcast %cst_39 : f32 to vector<1x1x1xf32>
    %116 = arith.mulf %114, %115 : vector<1x1x1xf32>
    %117 = vector.broadcast %116 : vector<1x1x1xf32> to vector<1x16x128xf32>
    %118 = arith.subf %106, %117 : vector<1x16x128xf32>
    %cst_40 = arith.constant 0.000000e+00 : f32
    %119 = vector.shape_cast %13 : vector<1x1x128xi1> to vector<1x1x128xi1>
    %120 = vector.broadcast %119 : vector<1x1x128xi1> to vector<1x16x128xi1>
    %121 = vector.broadcast %cst_40 : f32 to vector<1x16x128xf32>
    %122 = arith.select %120, %118, %121 : vector<1x16x128xi1>, vector<1x16x128xf32>
    %123 = arith.mulf %122, %122 : vector<1x16x128xf32>
    %cst_41 = arith.constant dense<0.000000e+00> : vector<1x16xf32>
    %124 = vector.multi_reduction <add>, %123, %cst_41 [2] : vector<1x16x128xf32> to vector<1x16xf32>
    %125 = vector.shape_cast %124 : vector<1x16xf32> to vector<1x16x1xf32>
    %cst_42 = arith.constant dense<0.000000e+00> : vector<1x1xf32>
    %126 = vector.multi_reduction <add>, %125, %cst_42 [1] : vector<1x16x1xf32> to vector<1x1xf32>
    %127 = vector.shape_cast %126 : vector<1x1xf32> to vector<1x1x1xf32>
    %cst_43 = arith.constant 3.906250e-03 : f32
    %128 = vector.broadcast %cst_43 : f32 to vector<1x1x1xf32>
    %129 = arith.mulf %127, %128 : vector<1x1x1xf32>
    %c1_44 = arith.constant 1 : index
    %130 = memref.load %arg5[%c1_44] : memref<3xf32, #tpu.memory_space<smem>>
    %cst_45 = arith.constant 9.99999974E-6 : f32
    %131 = vector.broadcast %cst_45 : f32 to vector<1x1x1xf32>
    %132 = arith.addf %129, %131 : vector<1x1x1xf32>
    %133 = math.rsqrt %132 : vector<1x1x1xf32>
    %134 = vector.broadcast %130 : f32 to vector<1x1x1xf32>
    %135 = arith.mulf %134, %133 : vector<1x1x1xf32>
    %136 = vector.broadcast %116 : vector<1x1x1xf32> to vector<1x16x128xf32>
    %137 = arith.subf %106, %136 : vector<1x16x128xf32>
    %138 = vector.broadcast %135 : vector<1x1x1xf32> to vector<1x16x128xf32>
    %139 = arith.mulf %138, %137 : vector<1x16x128xf32>
    %c1_46 = arith.constant 1 : index
    %140 = memref.load %arg6[%c1_46] : memref<3xf32, #tpu.memory_space<smem>>
    %141 = vector.broadcast %140 : f32 to vector<1x16x128xf32>
    %142 = arith.addf %139, %141 : vector<1x16x128xf32>
    %cst_47 = arith.constant 0.000000e+00 : f32
    %143 = vector.broadcast %cst_47 : f32 to vector<1x16x128xf32>
    %144 = arith.maximumf %142, %143 : vector<1x16x128xf32>
    %c0_48 = arith.constant 0 : index
    %c1_49 = arith.constant 1 : index
    %c0_50 = arith.constant 0 : index
    %c0_51 = arith.constant 0 : index
    %145 = vector.load %arg7[%c0_48, %c1_49, %c0_50, %c0_51] : memref<1x3x16x128xf32, #tpu.memory_space<vmem>>, vector<1x1x16x128xf32>
    %146 = vector.shape_cast %145 : vector<1x1x16x128xf32> to vector<1x16x128xf32>
    %147 = vector.shape_cast %144 : vector<1x16x128xf32> to vector<1x1x16x128xf32>
    tpu.vector_store %arg7[%c0_48, %c1_49, %c0_50, %c0_51], %147 {strides = array<i32>} : memref<1x3x16x128xf32, #tpu.memory_space<vmem>>, vector<1x1x16x128xf32>,
    %c4 = arith.constant 4 : index
    %148 = memref.load %arg3[%c4] : memref<6xf32, #tpu.memory_space<smem>>
    %149 = vector.broadcast %148 : f32 to vector<1x16x128xf32>
    %150 = arith.mulf %149, %45 : vector<1x16x128xf32>
    %c5 = arith.constant 5 : index
    %151 = memref.load %arg3[%c5] : memref<6xf32, #tpu.memory_space<smem>>
    %152 = vector.broadcast %151 : f32 to vector<1x16x128xf32>
    %153 = arith.mulf %152, %1 : vector<1x16x128xf32>
    %154 = arith.addf %150, %153 : vector<1x16x128xf32>
    %c2_52 = arith.constant 2 : index
    %155 = memref.load %arg4[%c2_52] : memref<3xf32, #tpu.memory_space<smem>>
    %156 = vector.broadcast %155 : f32 to vector<1x16x128xf32>
    %157 = arith.addf %154, %156 : vector<1x16x128xf32>
    %cst_53 = arith.constant 0.000000e+00 : f32
    %158 = vector.shape_cast %13 : vector<1x1x128xi1> to vector<1x1x128xi1>
    %159 = vector.broadcast %158 : vector<1x1x128xi1> to vector<1x16x128xi1>
    %160 = vector.broadcast %cst_53 : f32 to vector<1x16x128xf32>
    %161 = arith.select %159, %157, %160 : vector<1x16x128xi1>, vector<1x16x128xf32>
    %cst_54 = arith.constant dense<0.000000e+00> : vector<1x16xf32>
    %162 = vector.multi_reduction <add>, %161, %cst_54 [2] : vector<1x16x128xf32> to vector<1x16xf32>
    %163 = vector.shape_cast %162 : vector<1x16xf32> to vector<1x16x1xf32>
    %cst_55 = arith.constant dense<0.000000e+00> : vector<1x1xf32>
    %164 = vector.multi_reduction <add>, %163, %cst_55 [1] : vector<1x16x1xf32> to vector<1x1xf32>
    %165 = vector.shape_cast %164 : vector<1x1xf32> to vector<1x1x1xf32>
    %cst_56 = arith.constant 3.906250e-03 : f32
    %166 = vector.broadcast %cst_56 : f32 to vector<1x1x1xf32>
    %167 = arith.mulf %165, %166 : vector<1x1x1xf32>
    %168 = vector.broadcast %167 : vector<1x1x1xf32> to vector<1x16x128xf32>
    %169 = arith.subf %157, %168 : vector<1x16x128xf32>
    %cst_57 = arith.constant 0.000000e+00 : f32
    %170 = vector.shape_cast %13 : vector<1x1x128xi1> to vector<1x1x128xi1>
    %171 = vector.broadcast %170 : vector<1x1x128xi1> to vector<1x16x128xi1>
    %172 = vector.broadcast %cst_57 : f32 to vector<1x16x128xf32>
    %173 = arith.select %171, %169, %172 : vector<1x16x128xi1>, vector<1x16x128xf32>
    %174 = arith.mulf %173, %173 : vector<1x16x128xf32>
    %cst_58 = arith.constant dense<0.000000e+00> : vector<1x16xf32>
    %175 = vector.multi_reduction <add>, %174, %cst_58 [2] : vector<1x16x128xf32> to vector<1x16xf32>
    %176 = vector.shape_cast %175 : vector<1x16xf32> to vector<1x16x1xf32>
    %cst_59 = arith.constant dense<0.000000e+00> : vector<1x1xf32>
    %177 = vector.multi_reduction <add>, %176, %cst_59 [1] : vector<1x16x1xf32> to vector<1x1xf32>
    %178 = vector.shape_cast %177 : vector<1x1xf32> to vector<1x1x1xf32>
    %cst_60 = arith.constant 3.906250e-03 : f32
    %179 = vector.broadcast %cst_60 : f32 to vector<1x1x1xf32>
    %180 = arith.mulf %178, %179 : vector<1x1x1xf32>
    %c2_61 = arith.constant 2 : index
    %181 = memref.load %arg5[%c2_61] : memref<3xf32, #tpu.memory_space<smem>>
    %cst_62 = arith.constant 9.99999974E-6 : f32
    %182 = vector.broadcast %cst_62 : f32 to vector<1x1x1xf32>
    %183 = arith.addf %180, %182 : vector<1x1x1xf32>
    %184 = math.rsqrt %183 : vector<1x1x1xf32>
    %185 = vector.broadcast %181 : f32 to vector<1x1x1xf32>
    %186 = arith.mulf %185, %184 : vector<1x1x1xf32>
    %187 = vector.broadcast %167 : vector<1x1x1xf32> to vector<1x16x128xf32>
    %188 = arith.subf %157, %187 : vector<1x16x128xf32>
    %189 = vector.broadcast %186 : vector<1x1x1xf32> to vector<1x16x128xf32>
    %190 = arith.mulf %189, %188 : vector<1x16x128xf32>
    %c2_63 = arith.constant 2 : index
    %191 = memref.load %arg6[%c2_63] : memref<3xf32, #tpu.memory_space<smem>>
    %192 = vector.broadcast %191 : f32 to vector<1x16x128xf32>
    %193 = arith.addf %190, %192 : vector<1x16x128xf32>
    %cst_64 = arith.constant 0.000000e+00 : f32
    %194 = vector.broadcast %cst_64 : f32 to vector<1x16x128xf32>
    %195 = arith.maximumf %193, %194 : vector<1x16x128xf32>
    %c0_65 = arith.constant 0 : index
    %c2_66 = arith.constant 2 : index
    %c0_67 = arith.constant 0 : index
    %c0_68 = arith.constant 0 : index
    %196 = vector.load %arg7[%c0_65, %c2_66, %c0_67, %c0_68] : memref<1x3x16x128xf32, #tpu.memory_space<vmem>>, vector<1x1x16x128xf32>
    %197 = vector.shape_cast %196 : vector<1x1x16x128xf32> to vector<1x16x128xf32>
    %198 = vector.shape_cast %195 : vector<1x16x128xf32> to vector<1x1x16x128xf32>
    tpu.vector_store %arg7[%c0_65, %c2_66, %c0_67, %c0_68], %198 {strides = array<i32>} : memref<1x3x16x128xf32, #tpu.memory_space<vmem>>, vector<1x1x16x128xf32>,
    return
  }
  func.func @transform_0(%arg0: i32) -> (i32, i32, i32) {
    %c0_i32 = arith.constant 0 : i32
    %c0_i32_0 = arith.constant 0 : i32
    %c0_i32_1 = arith.constant 0 : i32
    return %arg0, %c0_i32, %c0_i32_0 : i32, i32, i32
  }
  func.func @transform_1(%arg0: i32) -> (i32, i32, i32) {
    %c0_i32 = arith.constant 0 : i32
    %c0_i32_0 = arith.constant 0 : i32
    %c0_i32_1 = arith.constant 0 : i32
    return %arg0, %c0_i32, %c0_i32_0 : i32, i32, i32
  }
  func.func @transform_2(%arg0: i32) -> i32 {
    %c0_i32 = arith.constant 0 : i32
    %c0_i32_0 = arith.constant 0 : i32
    return %c0_i32 : i32
  }
  func.func @transform_3(%arg0: i32) -> i32 {
    %c0_i32 = arith.constant 0 : i32
    %c0_i32_0 = arith.constant 0 : i32
    return %c0_i32 : i32
  }
  func.func @transform_4(%arg0: i32) -> i32 {
    %c0_i32 = arith.constant 0 : i32
    %c0_i32_0 = arith.constant 0 : i32
    return %c0_i32 : i32
  }
  func.func @transform_5(%arg0: i32) -> i32 {
    %c0_i32 = arith.constant 0 : i32
    %c0_i32_0 = arith.constant 0 : i32
    return %c0_i32 : i32
  }
  func.func @transform_6(%arg0: i32) -> (i32, i32, i32, i32) {
    %c0_i32 = arith.constant 0 : i32
    %c0_i32_0 = arith.constant 0 : i32
    %c0_i32_1 = arith.constant 0 : i32
    %c0_i32_2 = arith.constant 0 : i32
    return %arg0, %c0_i32, %c0_i32_0, %c0_i32_1 : i32, i32, i32, i32
  }
}

</mosaic_0001>

<bundles_post_ra>
// kernel: srlayer_forward.2
= control target key start
LH: loop header
LB: loop body
LE: loop exit
PB: predicated region body
PF: predicated region fallthrough
CT: control target
= control target key end

     0   :  { %s504_s12 = smov 0   ;;  %s551_s0 = inlined_call_operand.vmem [shape: f32[2,16,128], index: 0, kind: input, shape index: {}]   ;;  %s552_s1 = inlined_call_operand.vmem [shape: f32[2,16,128], index: 1, kind: input, shape index: {}]   ;;  %s553_s2 = inlined_call_operand.vmem [shape: f32[2,16,128], index: 2, kind: output, shape index: {0}]   ;;  %s554_s3 = inlined_call_operand.vmem [shape: f32[2,16,128], index: 3, kind: output, shape index: {1}]  }
   0x1 LB: > { %s433_s13 = sadd.s32 4294967295, %s480_s12   ;;  %p437_p0 = scmp.ge.s32.totalorder %s480_s12, 1  ;;  %s480_s12 = sphi %s504_s12, %s14_s12  }
   0x2   : > { %p150_p1 = scmp.lt.s32.totalorder %s480_s12, 3 }
   0x4   : > { %p151_p2 = pnand %p437_p0, %p150_p1 }
   0x5   : > { %p184_p3 = scmp.lt.s32.totalorder (!%p151_p2), %s433_s13, 1  ;;  %s482_s21 = smov (!%p151_p2), 1  }
   0x6   : > { %154 = sbr.rel (%p151_p2) target bundleno = 210 (0xd2), region = 28  ;;  %s483_s22 = smov (!%p151_p2), 127  }
   0xb   : > { %s556_s13 = smov (!%p184_p3, %s433_s13), 1  ;;  %v208_v42 = vlaneseq }
   0xc   : > { %s512_s14 = sshll.u32 %s556_s13, 4 }
   0xd   : > { %s188_s17 = scalar_lea.vmem %s551_s0, %s512_s14  ;;  %s193_s20 = scalar_lea.vmem %s552_s1, %s512_s14  ;;  %v209_v43 = vand.u32 127, %v208_v42  ;;  %v211_v49 = vshrl.u32 %v208_v42, 7 }
   0xe   : > { %v204_v0 = vld [vmem:[%s188_s17] sm:$0xff]  ;;  %v205_v2 = vld [vmem:[%s188_s17 + $0x8] sm:$0xff]  ;;  %s198_s25 = scalar_lea.vmem %s553_s2, %s512_s14  ;;  %s203_s28 = scalar_lea.vmem %s554_s3, %s512_s14 }
   0xf   : > { %v206_v1 = vld [vmem:[%s193_s20] sm:$0xff]  ;;  %v219_v3 = vmul.f32 %v204_v0, %v204_v0  ;;  %v207_v5 = vld [vmem:[%s193_s20 + $0x8] sm:$0xff]  ;;  %v220_v6 = vmul.f32 %v205_v2, %v205_v2  ;;  %vm213_vm8 = vcmp.ge.s32.totalorder %v209_v43, 1  ;;  %vm214_vm9 = vcmp.lt.s32.totalorder %v209_v43, 15 }
  0x10   : > { %v221_v4 = vmul.f32 %v206_v1, %v206_v1  ;;  %v222_v7 = vmul.f32 %v207_v5, %v207_v5  ;;  %v212_v58 = vadd.s32 8, %v211_v49  ;;  %vm215_vm10 = vcmp.ge.s32.totalorder %v211_v49, 1 }
  0x11   : > { %vm283_vm12 = vcmp.lt.s32.totalorder %v211_v49, 7  ;;  %vm294_vm13 = vcmp.lt.s32.totalorder %v211_v49, 1 }
  0x12   : > { %v223_v8 = vadd.f32 %v221_v4, %v219_v3  ;;  %v224_v9 = vadd.f32 %v222_v7, %v220_v6  ;;  %vm218_vm11 = vcmp.lt.s32.totalorder %v212_v58, 15 }
  0x14   : > { %vm225_vm0 = vcmp.gt.f32.partialorder %v223_v8, 0.0  ;;  %vm226_vm1 = vcmp.gt.f32.partialorder %v224_v9, 0.0 }
  0x15   : > { %v227_v10 = vsel %vm225_vm0, %v223_v8, 1.0  ;;  %v228_v11 = vsel %vm226_vm1, %v224_v9, 1.0 }
  0x16   : > { %462 = vrsqrt.f32 %v227_v10  ;;  %vm235_vm2 = vweird.f32 %v227_v10  ;;  %vm245_vm4 = vweird.f32 %v228_v11 }
  0x17   : > { %464 = vrsqrt.f32 %v228_v11 }
  0x1c   : > { %v463_v12 = vpop.eup %462 }
  0x1d   : > { %v465_v13 = vpop.eup %464  ;;  %v230_v14 = vmul.f32 %v463_v12, %v227_v10  ;;  %vm236_vm3 = vweird.f32 %v463_v12 }
  0x1e   : > { %v240_v15 = vmul.f32 %v465_v13, %v228_v11  ;;  %vm246_vm5 = vweird.f32 %v465_v13  ;;  %vm237_vm6 = vmor %vm235_vm2, %vm236_vm3 }
  0x1f   : > { %v231_v16 = vmul.f32 %v463_v12, %v230_v14  ;;  %vm247_vm7 = vmor %vm245_vm4, %vm246_vm5 }
  0x20   : > { %v241_v17 = vmul.f32 %v465_v13, %v240_v15 }
  0x21   : > { %v232_v18 = vmul.f32 0.5, %v231_v16 }
  0x22   : > { %v242_v19 = vmul.f32 0.5, %v241_v17 }
  0x23   : > { %v233_v20 = vsub.f32 1.5, %v232_v18 }
  0x24   : > { %v243_v21 = vsub.f32 1.5, %v242_v19 }
  0x25   : > { %v234_v22 = vmul.f32 %v463_v12, %v233_v20 }
  0x26   : > { %v244_v23 = vmul.f32 %v465_v13, %v243_v21 }
  0x27   : > { %v238_v24 = vsel %vm237_vm6, %v463_v12, %v234_v22 }
  0x28   : > { %v249_v25 = vmul.f32 %v238_v24, %v223_v8  ;;  %v317_v26 = vmul.f32 %v238_v24, %v204_v0  ;;  %v325_v27 = vmul.f32 %v238_v24, %v206_v1  ;;  %v248_v28 = vsel %vm247_vm7, %v465_v13, %v244_v23 }
  0x29   : > { %v250_v29 = vmul.f32 %v248_v28, %v224_v9  ;;  %v318_v30 = vmul.f32 %v248_v28, %v205_v2  ;;  %v326_v31 = vmul.f32 %v248_v28, %v207_v5 }
  0x2a   : > { %v251_v32 = vadd.f32 4.539993e-05, %v249_v25  ;;  %v525_v33 = vsel %vm225_vm0, %v317_v26, 1.0  ;;  %v528_v34 = vsel %vm225_vm0, %v325_v27, 0.0 }
  0x2b   : > { %v531_v35 = vsel %vm226_vm1, %v318_v30, 1.0  ;;  %v534_v36 = vsel %vm226_vm1, %v326_v31, 0.0  ;;  %v252_v37 = vadd.f32 4.539993e-05, %v250_v29 }
  0x2c   : > { %466 = vlog2.f32 %v251_v32 }
  0x2d   : > { %468 = vlog2.f32 %v252_v37 }
  0x32   : > { %v467_v38 = vpop.eup %466 }
  0x33   : > { %v254_v39 = vmul.f32 0.6931472, %v467_v38  ;;  %v469_v40 = vpop.eup %468 }
  0x34   : > { %v256_v41 = vmul.f32 0.6931472, %v469_v40 }
  0x35   : > { %265 = vrot.lane.b32.xlu1 %v254_v39, %s482_s21  ;;  %257 = vrot.lane.b32.xlu0 %v254_v39, %s483_s22  ;;  %v273_v50 = vmul.f32 0.33333334, %v254_v39 }
  0x36   : > { %v274_v56 = vmul.f32 0.33333334, %v256_v41 }
  0x3d   : > { %267 = vrot.lane.b32.xlu1 %v256_v41, %s482_s21  ;;  %259 = vrot.lane.b32.xlu0 %v256_v41, %s483_s22 }
  0xa7   : > { %v266_v44 = vpop.permute.xlu1 %265  ;;  %v258_v45 = vpop.permute.xlu0 %257 }
  0xa8   : > { %v271_v46 = vsel %vm213_vm8, %v266_v44, 0.0  ;;  %v263_v47 = vsel %vm214_vm9, %v258_v45, 0.0 }
  0xa9   : > { %v275_v48 = vadd.f32 %v271_v46, %v263_v47 }
  0xab   : > { %v277_v51 = vmul.f32 0.33333334, %v275_v48 }
  0xad   : > { %v279_v59 = vadd.f32 %v277_v51, %v273_v50 }
  0xaf   : > { %v268_v52 = vpop.permute.xlu1 %267  ;;  %v260_v53 = vpop.permute.xlu0 %259  ;;  %v281_v62 = vrot.slane %v279_v59, 1  ;;  %v292_v63 = vrot.slane %v279_v59, 7  ;;  %v303_v10 = vmul.f32 0.33333334, %v279_v59 }
  0xb0   : > { %v272_v54 = vsel %vm213_vm8, %v268_v52, 0.0  ;;  %v264_v55 = vsel %vm214_vm9, %v260_v53, 0.0 }
  0xb1   : > { %v276_v57 = vadd.f32 %v272_v54, %v264_v55 }
  0xb3   : > { %v278_v60 = vmul.f32 0.33333334, %v276_v57 }
  0xb5   : > { %v280_v61 = vadd.f32 %v278_v60, %v274_v56 }
  0xb7   : > { %v282_v0 = vrot.slane %v280_v61, 1  ;;  %v293_v1 = vrot.slane %v280_v61, 7  ;;  %v304_v11 = vmul.f32 0.33333334, %v280_v61 }
  0xb9   : > { %v284_v2 = vsel %vm283_vm12, %v281_v62, %v282_v0  ;;  %v285_v3 = vsel %vm283_vm12, %v282_v0, %v281_v62  ;;  %v295_v4 = vsel %vm294_vm13, %v292_v63, %v293_v1  ;;  %v296_v5 = vsel %vm294_vm13, %v293_v1, %v292_v63 }
  0xba   : > { %v291_v6 = vsel %vm218_vm11, %v285_v3, 0.0  ;;  %v301_v7 = vsel %vm215_vm10, %v296_v5, 0.0 }
  0xbb   : > { %v305_v8 = vadd.f32 %v301_v7, %v284_v2  ;;  %v306_v9 = vadd.f32 %v295_v4, %v291_v6 }
  0xbd   : > { %v307_v12 = vmul.f32 0.33333334, %v305_v8  ;;  %v308_v13 = vmul.f32 0.33333334, %v306_v9 }
  0xbf   : > { %v309_v14 = vadd.f32 %v307_v12, %v303_v10  ;;  %v310_v15 = vadd.f32 %v308_v13, %v304_v11 }
  0xc1   : > { %v311_v16 = vsub.f32 %v254_v39, %v309_v14  ;;  %v312_v17 = vsub.f32 %v256_v41, %v310_v15 }
  0xc3   : > { %v313_v18 = vmul.f32 1.442695, %v311_v16  ;;  %v315_v19 = vmul.f32 1.442695, %v312_v17 }
  0xc5   : > { %470 = vpow2.f32 %v313_v18 }
  0xc6   : > { %472 = vpow2.f32 %v315_v19 }
  0xcb   : > { %v471_v20 = vpop.eup %470 }
  0xcc   : > { %v473_v21 = vpop.eup %472  ;;  %v321_v22 = vmul.f32 %v471_v20, %v525_v33  ;;  %v329_v23 = vmul.f32 %v471_v20, %v528_v34 }
  0xcd   : > { %v322_v24 = vmul.f32 %v473_v21, %v531_v35  ;;  %v330_v25 = vmul.f32 %v473_v21, %v534_v36 }
  0xce   : > { %323 = vst [vmem:[%s198_s25] sm:$0xff] %v321_v22 }
  0xcf   : > { %324 = vst [vmem:[%s198_s25 + $0x8] sm:$0xff] %v322_v24 }
  0xd0   : > { %331 = vst [vmem:[%s203_s28] sm:$0xff] %v329_v23 }
  0xd1   : > { %332 = vst [vmem:[%s203_s28 + $0x8] sm:$0xff] %v330_v25 }
  0xd2 PF: > { %s14_s12 = sadd.s32 1, %s480_s12  }
  0xd3   : > { %p11_p4 = scmp.ge.s32.totalorder %s14_s12, 4  }
  0xd5   :  { %13 = sbr.rel (!%p11_p4) target bundleno = 1 (0x1), region = 73 }

// kernel: srlayer_forward.3
= control target key start
LH: loop header
LB: loop body
LE: loop exit
PB: predicated region body
PF: predicated region fallthrough
CT: control target
= control target key end

     0   :  { %11 = vsyncpa [#allocation4], 0  ;;  %s1278_s0 = inlined_call_operand.vmem [shape: f32[2,16,128], index: 0, kind: input, shape index: {}]   ;;  %s1279_s1 = inlined_call_operand.vmem [shape: f32[2,16,128], index: 1, kind: input, shape index: {}]   ;;  %s1280_s2 = inlined_call_operand.vmem [shape: f32[6], index: 2, kind: input, shape index: {}]   ;;  %s1281_s3 = inlined_call_operand.vmem [shape: f32[3], index: 3, kind: input, shape index: {}]   ;;  %s1282_s4 = inlined_call_operand.vmem [shape: f32[3], index: 4, kind: input, shape index: {}]   ;;  %s1283_s5 = inlined_call_operand.vmem [shape: f32[3], index: 5, kind: input, shape index: {}]   ;;  %s1284_s6 = inlined_call_operand.hbm [shape: f32[2,3,16,128], index: 6, kind: output, shape index: {}]  }
   0x1   :  { %12 = vsyncpa [#allocation6], 0 }
   0x2   :  { %13 = vsyncpa [#allocation9], 0 }
   0x3   :  { %14 = vsyncpa [#allocation3], 0 }
   0x4   :  { %16 = vsyncpa [#allocation3 + $0x1], 0  ;;  %s1044_s21 = smov 0   ;;  %s1046_s22 = smov 0  }
   0x5   :  { %s1048_s23 = smov 0   ;;  %s1050_s24 = smov 0  }
   0x6 LB: > { %s1065_s25 = sadd.s32 4294967295, %s999_s24   ;;  %s737_s26 = sadd.s32 4294967294, %s999_s24   ;;  %s999_s24 = sphi %s1050_s24, %s1291_s24   ;;  %s995_s23 = sphi %s1048_s23, %s1290_s23   ;;  %s991_s22 = sphi %s1046_s22, %s1289_s22   ;;  %s987_s21 = sphi %s1044_s21, %s1288_s21  }
   0x7   : > { %s1069_s27 = sadd.s32 1, %s999_s24   ;;  %s165_s28 = sadd.s32 1, %s995_s23 }
   0x8   : > { %s162_s29 = ssub.s32 %s999_s24, %s1069_s27  ;;  %p175_p0 = scmp.ne.s32.totalorder %s995_s23, %s991_s22 }
   0x9   : > { %p163_p1 = scmp.eq.s32.totalorder %s162_s29, 0  ;;  %p176_p2 = scmp.eq.s32.totalorder %s1065_s25, 1 }
   0xa   : > { %p181_p3 = scmp.ne.s32.totalorder %s991_s22, %s987_s21  ;;  %p182_p4 = scmp.eq.s32.totalorder %s737_s26, 1 }
   0xb   : > { %s1080_s30 = scalar_select %p163_p1, %s995_s23, %s165_s28  }
   0xc   : > { %p1082_p5 = por %p176_p2, %p175_p0  ;;  %p1086_p6 = por %p182_p4, %p181_p3 }
   0xd   : > { %p738_p7 = scmp.ge.s32.totalorder %s999_s24, 1  ;;  %p189_p8 = scmp.lt.s32.totalorder %s999_s24, 3 }
   0xe   : > { %p810_p9 = scmp.eq.s32.totalorder %s1065_s25, 0  ;;  %s211_s12 = sshll.u32 %s1281_s3, 4  ;;  %s212_s12 = int_to_ptr.vmem [resolvable:$true] %s211_s12 }
   0xf   : > { %p1093_p10 = pnand %p738_p7, %p189_p8  ;;  %s201_s15 = sshll.u32 %s1280_s2, 4  ;;  %s202_s15 = int_to_ptr.vmem [resolvable:$true] %s201_s15 }
  0x10   : > { %s221_s18 = sshll.u32 %s1282_s4, 4  ;;  %s231_s26 = sshll.u32 %s1283_s5, 4  ;;  %s222_s18 = int_to_ptr.vmem [resolvable:$true] %s221_s18  ;;  %s232_s26 = int_to_ptr.vmem [resolvable:$true] %s231_s26 }
  0x11   : > { %p793_p11 = pneg %p1093_p10  ;;  %s1001_s28 = smov [#allocation5]  }
  0x12   : > { %s1002_s29 = smov [#allocation2]   ;;  %s1003_s10 = smov [#allocation7]  }
  0x13   : > { %p794_p12 = pnand %p810_p9, %p793_p11  ;;  %s1004_s11 = smov [#allocation8]  }
  0x14   : > { %260 = sbr.rel (%p1093_p10) target bundleno = 521 (0x209), region = 44 }
  0x15   : > { %799 = dma.vmem_to_smem (!%p794_p12), %s212_s12, 16, %s1001_s28, [#allocation6]  }
  0x16   : > { %796 = dma.vmem_to_smem (!%p794_p12), %s202_s15, 16, %s1002_s29, [#allocation4]  }
  0x17   : > { %802 = dma.vmem_to_smem (!%p794_p12), %s222_s18, 16, %s1003_s10, [#allocation6]  }
  0x18   : > { %805 = dma.vmem_to_smem (!%p794_p12), %s232_s26, 16, %s1004_s11, [#allocation9]  }
  0x19   : > { %970 = dma.done.wait (%p810_p9), [#allocation4], 16  }
  0x1a   : > { %972 = vsyncadd (%p810_p9), [#allocation4], 4294967280 }
  0x1b   : > { %974 = dma.done.wait (%p810_p9), [#allocation6], 32  }
  0x1c   : > { %976 = vsyncadd (%p810_p9), [#allocation6], 4294967264 }
  0x1d   : > { %978 = dma.done.wait (%p810_p9), [#allocation9], 16  }
  0x1e   : > { %980 = vsyncadd (%p810_p9), [#allocation9], 4294967280 }
  0x1f   : > { %282 = sfence }
  0x20   : > { %p312_p13 = scmp.lt.s32.totalorder %s1065_s25, 1  ;;  %s1005_s16 = smov 1   ;;  %v326_v2 = vlaneseq }
  0x21   : > { %s1006_s17 = smov 127   ;;  %s1141_s18 = sld [smem:[#allocation2 + $0x2]] }
  0x22   : > { %s1129_s9 = scalar_select %p312_p13, %s1065_s25, 1  ;;  %v1137_v3 = vand.u32 127, %v326_v2  ;;  %v329_v9 = vshrl.u32 %v326_v2, 7 }
  0x23   : > { %s1143_s19 = sld [smem:[#allocation2 + $0x3]]  ;;  %s774_s10 = smul.u32 48, %s1065_s25 }
  0x24   : > { %s771_s12 = sshll.u32 %s1129_s9, 4  ;;  %vm331_vm0 = vcmp.ge.s32.totalorder %v1137_v3, 1  ;;  %vm332_vm1 = vcmp.lt.s32.totalorder %v1137_v3, 15  ;;  %v330_v18 = vadd.s32 8, %v329_v9  ;;  %s1145_s20 = sld [smem:[#allocation2 + $0x1]]  ;;  %vm333_vm2 = vcmp.ge.s32.totalorder %v329_v9, 1 }
  0x25   : > { %s316_s15 = scalar_lea.vmem %s1278_s0, %s771_s12  ;;  %s1147_s26 = sld [smem:[#allocation2 + $0x5]]  ;;  %vm364_vm4 = vcmp.lt.s32.totalorder %v329_v9, 7  ;;  %vm375_vm5 = vcmp.lt.s32.totalorder %v329_v9, 1  ;;  %vm337_vm6 = vcmp.lt.s32.totalorder %v1137_v3, 16 }
  0x26   : > { %v322_v0 = vld [vmem:[%s316_s15] sm:$0xff]  ;;  %v323_v1 = vld [vmem:[%s316_s15 + $0x8] sm:$0xff]  ;;  %vm336_vm3 = vcmp.lt.s32.totalorder %v330_v18, 15  ;;  %s1149_s28 = sld [smem:[#allocation2]]  ;;  %s321_s13 = scalar_lea.vmem %s1279_s1, %s771_s12 }
  0x27   : > { %346 = vrot.lane.b32.xlu1 %v322_v0, %s1005_s16  ;;  %338 = vrot.lane.b32.xlu0 %v322_v0, %s1006_s17  ;;  %v354_v10 = vmul.f32 0.5, %v322_v0  ;;  %v355_v16 = vmul.f32 0.5, %v323_v1  ;;  %s1151_s29 = sld [smem:[#allocation2 + $0x4]]  ;;  %v324_v32 = vld [vmem:[%s321_s13] sm:$0xff]  ;;  %v325_v33 = vld [vmem:[%s321_s13 + $0x8] sm:$0xff] }
  0x28   : > { %s1158_s14 = sld [smem:[#allocation5 + $0x1]]  ;;  %v465_v38 = vstv %s1141_s18  ;;  %s309_s18 = sand.u32 1, %s991_s22  }
  0x29   : > { %s1161_s15 = sld [smem:[#allocation5]]  ;;  %v469_v35 = vstv %s1143_s19  ;;  %s773_s19 = smul.u32 48, %s309_s18 }
  0x2a   : > { %v397_v37 = vstv %s1145_s20  ;;  %v471_v44 = vmul.f32 %v469_v35, %v325_v33  ;;  %v470_v45 = vmul.f32 %v469_v35, %v324_v32  ;;  %s763_s9 = sld [smem:[#allocation5 + $0x2]] }
  0x2b   : > { %v540_v39 = vstv %s1147_s26  ;;  %v398_v47 = vmul.f32 %v397_v37, %v324_v32  ;;  %v399_v50 = vmul.f32 %v397_v37, %v325_v33  ;;  %s440_s12 = sld [smem:[#allocation7]] }
  0x2c   : > { %v393_v46 = vstv %s1149_s28  ;;  %v541_v52 = vmul.f32 %v540_v39, %v324_v32  ;;  %v542_v53 = vmul.f32 %v540_v39, %v325_v33  ;;  %s1225_s20 = sld [smem:[#allocation8 + $0x2]]  ;;  %s1230_s28 = scalar_lea.vmem [#allocation10], %s773_s19 }
  0x2d   : > { %v536_v51 = vstv %s1151_s29  ;;  %s1227_s26 = sld [smem:[#allocation7 + $0x1]]  ;;  %s619_s25 = sshll.u32 %s1230_s28, 4  ;;  %s620_s25 = int_to_ptr.vmem [resolvable:$true] %s619_s25 }
  0x2e   : > { %v475_v58 = vstv %s1158_s14  ;;  %s758_s29 = sld [smem:[#allocation8 + $0x1]]  ;;  %s618_s14 = scalar_lea.hbm %s1284_s6, %s774_s10 }
  0x2f   : > { %348 = vrot.lane.b32.xlu1 %v323_v1, %s1005_s16  ;;  %340 = vrot.lane.b32.xlu0 %v323_v1, %s1006_s17  ;;  %v403_v59 = vstv %s1161_s15  ;;  %s456_s16 = sld [smem:[#allocation8]]  ;;  %s621_s15 = sshll.u32 %s618_s14, 4  ;;  %s622_s15 = int_to_ptr.hbm [resolvable:$true] %s621_s15 }
  0x30   : > { %s1218_s17 = sld [smem:[#allocation7 + $0x2]] }
  0x99   : > { %v347_v4 = vpop.permute.xlu1 %346  ;;  %v339_v5 = vpop.permute.xlu0 %338 }
  0x9a   : > { %v352_v6 = vsel %vm331_vm0, %v347_v4, 0.0  ;;  %v344_v7 = vsel %vm332_vm1, %v339_v5, 0.0 }
  0x9b   : > { %v356_v8 = vadd.f32 %v352_v6, %v344_v7 }
  0x9d   : > { %v358_v11 = vmul.f32 0.25, %v356_v8 }
  0x9f   : > { %v360_v19 = vadd.f32 %v358_v11, %v354_v10 }
  0xa1   : > { %v349_v12 = vpop.permute.xlu1 %348  ;;  %v341_v13 = vpop.permute.xlu0 %340  ;;  %v362_v22 = vrot.slane %v360_v19, 1  ;;  %v373_v23 = vrot.slane %v360_v19, 7  ;;  %v384_v40 = vmul.f32 0.5, %v360_v19 }
  0xa2   : > { %v353_v14 = vsel %vm331_vm0, %v349_v12, 0.0  ;;  %v345_v15 = vsel %vm332_vm1, %v341_v13, 0.0  ;;  %v546_v13 = vstv %s763_s9  ;;  %s607_s9 = scalar_lea.sflag [#allocation3], %s309_s18 }
  0xa3   : > { %v357_v17 = vadd.f32 %v353_v14, %v345_v15 }
  0xa5   : > { %v359_v20 = vmul.f32 0.25, %v357_v17 }
  0xa7   : > { %v361_v21 = vadd.f32 %v359_v20, %v355_v16 }
  0xa9   : > { %v363_v24 = vrot.slane %v361_v21, 1  ;;  %v374_v25 = vrot.slane %v361_v21, 7  ;;  %v385_v41 = vmul.f32 0.5, %v361_v21 }
  0xab   : > { %v365_v26 = vsel %vm364_vm4, %v362_v22, %v363_v24  ;;  %v366_v27 = vsel %vm364_vm4, %v363_v24, %v362_v22  ;;  %v376_v28 = vsel %vm375_vm5, %v373_v23, %v374_v25  ;;  %v377_v29 = vsel %vm375_vm5, %v374_v25, %v373_v23 }
  0xac   : > { %v372_v30 = vsel %vm336_vm3, %v366_v27, 0.0  ;;  %v382_v31 = vsel %vm333_vm2, %v377_v29, 0.0 }
  0xad   : > { %v387_v34 = vadd.f32 %v376_v28, %v372_v30  ;;  %v386_v36 = vadd.f32 %v382_v31, %v365_v26 }
  0xaf   : > { %v389_v42 = vmul.f32 0.25, %v387_v34  ;;  %v388_v43 = vmul.f32 0.25, %v386_v36 }
  0xb1   : > { %v391_v48 = vadd.f32 %v389_v42, %v385_v41  ;;  %v390_v49 = vadd.f32 %v388_v43, %v384_v40 }
  0xb3   : > { %v467_v54 = vmul.f32 %v465_v38, %v391_v48  ;;  %v466_v55 = vmul.f32 %v465_v38, %v390_v49  ;;  %v394_v56 = vmul.f32 %v393_v46, %v390_v49  ;;  %v395_v57 = vmul.f32 %v393_v46, %v391_v48 }
  0xb4   : > { %v537_v60 = vmul.f32 %v536_v51, %v390_v49  ;;  %v538_v61 = vmul.f32 %v536_v51, %v391_v48 }
  0xb5   : > { %v473_v62 = vadd.f32 %v471_v44, %v467_v54  ;;  %v472_v63 = vadd.f32 %v470_v45, %v466_v55  ;;  %v400_v0 = vadd.f32 %v398_v47, %v394_v56  ;;  %v401_v1 = vadd.f32 %v399_v50, %v395_v57 }
  0xb6   : > { %v543_v2 = vadd.f32 %v541_v52, %v537_v60  ;;  %v544_v4 = vadd.f32 %v542_v53, %v538_v61 }
  0xb7   : > { %v1172_v5 = vadd.f32 %v475_v58, %v473_v62  ;;  %v476_v6 = vadd.f32 %v475_v58, %v472_v63  ;;  %v404_v7 = vadd.f32 %v403_v59, %v400_v0  ;;  %v405_v11 = vadd.f32 %v403_v59, %v401_v1 }
  0xb8   : > { %v547_v14 = vadd.f32 %v546_v13, %v543_v2  ;;  %v548_v16 = vadd.f32 %v546_v13, %v544_v4 }
  0xb9   : > { %v479_v8 = vsel %vm337_vm6, %v1172_v5, 0.0  ;;  %v478_v9 = vsel %vm337_vm6, %v476_v6, 0.0  ;;  %v408_v10 = vsel %vm337_vm6, %v404_v7, 0.0  ;;  %v409_v12 = vsel %vm337_vm6, %v405_v11, 0.0 }
  0xba   : > { %482 = vadd.xlane.f32.xlu1 %v479_v8  ;;  %480 = vadd.xlane.f32.xlu0 %v478_v9  ;;  %v549_v15 = vsel %vm337_vm6, %v547_v14, 0.0  ;;  %v550_v17 = vsel %vm337_vm6, %v548_v16, 0.0 }
  0xbb   : > { %410 = vadd.xlane.f32.xlu2 %v408_v10 }
  0xc3   : > { %412 = vadd.xlane.f32.xlu2 %v409_v12 }
  0xcb   : > { %551 = vadd.xlane.f32.xlu2 %v549_v15 }
  0xd3   : > { %553 = vadd.xlane.f32.xlu2 %v550_v17 }
 0x12d   : > { %v483_v19 = vpop.xlane.xlu1 %482  ;;  %v481_v20 = vpop.xlane.xlu0 %480 }
 0x12e   : > { %v411_v18 = vpop.xlane.xlu2 %410  ;;  %v484_v21 = vadd.f32 %v483_v19, %v481_v20 }
 0x130   : > { %v485_v23 = vrot.slane %v484_v21, 4 }
 0x132   : > { %v486_v26 = vadd.f32 %v485_v23, %v484_v21 }
 0x134   : > { %v487_v30 = vrot.slane %v486_v26, 2 }
 0x136   : > { %v413_v22 = vpop.xlane.xlu2 %412  ;;  %v488_v33 = vadd.f32 %v487_v30, %v486_v26 }
 0x137   : > { %v414_v24 = vadd.f32 %v413_v22, %v411_v18 }
 0x138   : > { %v489_v37 = vrot.slane %v488_v33, 1 }
 0x139   : > { %v415_v25 = vrot.slane %v414_v24, 4 }
 0x13a   : > { %v490_v45 = vadd.f32 %v489_v37, %v488_v33 }
 0x13b   : > { %v416_v27 = vadd.f32 %v415_v25, %v414_v24 }
 0x13c   : > { %v491_v49 = vmul.f32 0.00390625, %v490_v45 }
 0x13d   : > { %v417_v28 = vrot.slane %v416_v27, 2 }
 0x13e   : > { %v552_v29 = vpop.xlane.xlu2 %551  ;;  %v1197_v52 = vsub.f32 %v476_v6, %v491_v49  ;;  %v1213_v63 = vsub.f32 %v1172_v5, %v491_v49  ;;  %v457_v49 = vstv %s456_s16 }
 0x13f   : > { %v418_v31 = vadd.f32 %v417_v28, %v416_v27 }
 0x140   : > { %v494_v55 = vsel %vm337_vm6, %v1197_v52, 0.0  ;;  %v495_v0 = vsel %vm337_vm6, %v1213_v63, 0.0 }
 0x141   : > { %v419_v32 = vrot.slane %v418_v31, 1  ;;  %v496_v60 = vmul.f32 %v494_v55, %v494_v55  ;;  %v497_v1 = vmul.f32 %v495_v0, %v495_v0 }
 0x143   : > { %v420_v34 = vadd.f32 %v419_v32, %v418_v31 }
 0x145   : > { %v421_v35 = vmul.f32 0.00390625, %v420_v34 }
 0x146   : > { %v554_v36 = vpop.xlane.xlu2 %553 }
 0x147   : > { %v555_v38 = vadd.f32 %v554_v36, %v552_v29  ;;  %v1187_v39 = vsub.f32 %v404_v7, %v421_v35  ;;  %v1192_v44 = vsub.f32 %v405_v11, %v421_v35 }
 0x149   : > { %v556_v40 = vrot.slane %v555_v38, 4  ;;  %v424_v41 = vsel %vm337_vm6, %v1187_v39, 0.0  ;;  %v425_v48 = vsel %vm337_vm6, %v1192_v44, 0.0 }
 0x14a   : > { %v426_v42 = vmul.f32 %v424_v41, %v424_v41  ;;  %v427_v51 = vmul.f32 %v425_v48, %v425_v48 }
 0x14b   : > { %v557_v43 = vadd.f32 %v556_v40, %v555_v38 }
 0x14c   : > { %428 = vadd.xlane.f32.xlu2 %v426_v42  ;;  %v452_v42 = vstv %s440_s12  ;;  %s939_s12 = sshra.s32 %s622_s15, 4  ;;  %s940_s12 = int_to_ptr.hbm [resolvable:$true] %s939_s12 }
 0x14d   : > { %v558_v46 = vrot.slane %v557_v43, 2  ;;  %s941_s16 = scalar_lea.hbm %s940_s12, 48  ;;  %p946_p3 = scmp.lt.s32.totalorder %s940_s12, %s1284_s6 }
 0x14e   : > { %p942_p0 = scmp.ne.s32.totalorder %s940_s12, %s941_s16 }
 0x14f   : > { %v559_v47 = vadd.f32 %v558_v46, %v557_v43 }
 0x150   : > { %p943_p1 = pnand %p942_p0, %p1082_p5 }
 0x151   : > { %v560_v50 = vrot.slane %v559_v47, 1 }
 0x152   : > { %p944_p2 = pneg %p943_p1 }
 0x153   : > { %v561_v53 = vadd.f32 %v560_v50, %v559_v47 }
 0x154   : > { %430 = vadd.xlane.f32.xlu2 %v427_v51 }
 0x155   : > { %v562_v54 = vmul.f32 0.00390625, %v561_v53 }
 0x157   : > { %v1202_v56 = vsub.f32 %v548_v16, %v562_v54  ;;  %v1204_v57 = vsub.f32 %v547_v14, %v562_v54 }
 0x159   : > { %v566_v58 = vsel %vm337_vm6, %v1202_v56, 0.0  ;;  %v565_v59 = vsel %vm337_vm6, %v1204_v57, 0.0 }
 0x15a   : > { %v568_v61 = vmul.f32 %v566_v58, %v566_v58  ;;  %v567_v62 = vmul.f32 %v565_v59, %v565_v59 }
 0x15c   : > { %498 = vadd.xlane.f32.xlu2 %v496_v60  ;;  %571 = vadd.xlane.f32.xlu1 %v568_v61  ;;  %v593_v60 = vstv %s1218_s17 }
 0x15d   : > { %569 = vadd.xlane.f32.xlu0 %v567_v62 }
 0x164   : > { %500 = vadd.xlane.f32.xlu2 %v497_v1 }
 0x1bf   : > { %v429_v2 = vpop.xlane.xlu2 %428 }
 0x1c7   : > { %v431_v4 = vpop.xlane.xlu2 %430 }
 0x1c8   : > { %v432_v6 = vadd.f32 %v431_v4, %v429_v2 }
 0x1ca   : > { %v433_v7 = vrot.slane %v432_v6, 4 }
 0x1cc   : > { %v434_v8 = vadd.f32 %v433_v7, %v432_v6  ;;  %v598_v6 = vstv %s1225_s20  ;;  %s945_s20 = scalar_lea.hbm %s1284_s6, 96 }
 0x1cd   : > { %p947_p4 = scmp.lt.s32.totalorder %s945_s20, %s941_s16 }
 0x1ce   : > { %v435_v9 = vrot.slane %v434_v8, 2 }
 0x1cf   : > { %v572_v10 = vpop.xlane.xlu1 %571  ;;  %v499_v11 = vpop.xlane.xlu2 %498  ;;  %p948_p7 = por %p947_p4, %p946_p3 }
 0x1d0   : > { %v436_v12 = vadd.f32 %v435_v9, %v434_v8  ;;  %v570_v5 = vpop.xlane.xlu0 %569 }
 0x1d1   : > { %v573_v13 = vadd.f32 %v572_v10, %v570_v5  ;;  %v522_v10 = vstv %s1227_s26  ;;  %p949_p8 = pnand %p948_p7, %p944_p2 }
 0x1d2   : > { %v437_v14 = vrot.slane %v436_v12, 1 }
 0x1d3   : > { %v574_v15 = vrot.slane %v573_v13, 4 }
 0x1d4   : > { %v438_v16 = vadd.f32 %v437_v14, %v436_v12 }
 0x1d5   : > { %v575_v17 = vadd.f32 %v574_v15, %v573_v13 }
 0x1d6   : > { %v439_v18 = vmul.f32 0.00390625, %v438_v16 }
 0x1d7   : > { %v576_v3 = vrot.slane %v575_v17, 2  ;;  %v501_v19 = vpop.xlane.xlu2 %500 }
 0x1d8   : > { %v441_v20 = vadd.f32 1e-05, %v439_v18  ;;  %v502_v21 = vadd.f32 %v501_v19, %v499_v11 }
 0x1d9   : > { %v577_v22 = vadd.f32 %v576_v3, %v575_v17 }
 0x1da   : > { %859 = vrsqrt.f32 %v441_v20  ;;  %v503_v23 = vrot.slane %v502_v21, 4  ;;  %vm448_vm8 = vweird.f32 %v441_v20 }
 0x1db   : > { %v578_v24 = vrot.slane %v577_v22, 1 }
 0x1dc   : > { %v504_v25 = vadd.f32 %v503_v23, %v502_v21 }
 0x1dd   : > { %v579_v26 = vadd.f32 %v578_v24, %v577_v22 }
 0x1de   : > { %v505_v27 = vrot.slane %v504_v25, 2 }
 0x1df   : > { %v580_v28 = vmul.f32 0.00390625, %v579_v26 }
 0x1e0   : > { %v860_v29 = vpop.eup %859  ;;  %v506_v30 = vadd.f32 %v505_v27, %v504_v25 }
 0x1e1   : > { %v443_v31 = vmul.f32 %v860_v29, %v441_v20  ;;  %v582_v32 = vadd.f32 1e-05, %v580_v28  ;;  %vm449_vm7 = vweird.f32 %v860_v29 }
 0x1e2   : > { %v507_v33 = vrot.slane %v506_v30, 1  ;;  %vm450_vm9 = vmor %vm448_vm8, %vm449_vm7 }
 0x1e3   : > { %v444_v34 = vmul.f32 %v860_v29, %v443_v31  ;;  %861 = vrsqrt.f32 %v582_v32  ;;  %vm589_vm11 = vweird.f32 %v582_v32 }
 0x1e4   : > { %v508_v35 = vadd.f32 %v507_v33, %v506_v30 }
 0x1e5   : > { %v445_v36 = vmul.f32 0.5, %v444_v34 }
 0x1e6   : > { %v509_v37 = vmul.f32 0.00390625, %v508_v35 }
 0x1e7   : > { %v446_v38 = vsub.f32 1.5, %v445_v36 }
 0x1e8   : > { %v511_v40 = vadd.f32 1e-05, %v509_v37 }
 0x1e9   : > { %v862_v41 = vpop.eup %861  ;;  %v447_v43 = vmul.f32 %v860_v29, %v446_v38 }
 0x1ea   : > { %v584_v45 = vmul.f32 %v862_v41, %v582_v32  ;;  %863 = vrsqrt.f32 %v511_v40  ;;  %vm590_vm10 = vweird.f32 %v862_v41  ;;  %vm518_vm14 = vweird.f32 %v511_v40 }
 0x1eb   : > { %v451_v46 = vsel %vm450_vm9, %v860_v29, %v447_v43  ;;  %vm591_vm12 = vmor %vm589_vm11, %vm590_vm10 }
 0x1ec   : > { %v453_v47 = vmul.f32 %v452_v42, %v451_v46  ;;  %v585_v48 = vmul.f32 %v862_v41, %v584_v45 }
 0x1ee   : > { %v454_v50 = vmul.f32 %v453_v47, %v1187_v39  ;;  %v455_v51 = vmul.f32 %v453_v47, %v1192_v44  ;;  %v586_v53 = vmul.f32 0.5, %v585_v48 }
 0x1f0   : > { %v864_v54 = vpop.eup %863  ;;  %v458_v55 = vadd.f32 %v457_v49, %v454_v50  ;;  %v459_v58 = vadd.f32 %v457_v49, %v455_v51  ;;  %v587_v59 = vsub.f32 1.5, %v586_v53 }
 0x1f1   : > { %v513_v61 = vmul.f32 %v864_v54, %v511_v40  ;;  %vm519_vm13 = vweird.f32 %v864_v54 }
 0x1f2   : > { %v460_v62 = vmax.f32 %v458_v55, 0.0  ;;  %v461_v0 = vmax.f32 %v459_v58, 0.0  ;;  %v588_v1 = vmul.f32 %v862_v41, %v587_v59  ;;  %vm520_vm15 = vmor %vm518_vm14, %vm519_vm13 }
 0x1f3   : > { %v514_v39 = vmul.f32 %v864_v54, %v513_v61 }
 0x1f4   : > { %462 = vst [vmem:[%s1230_s28] sm:$0xff] %v460_v62  ;;  %v592_v44 = vsel %vm591_vm12, %v862_v41, %v588_v1 }
 0x1f5   : > { %463 = vst [vmem:[%s1230_s28 + $0x8] sm:$0xff] %v461_v0  ;;  %v594_v2 = vmul.f32 %v593_v60, %v592_v44  ;;  %v515_v4 = vmul.f32 0.5, %v514_v39 }
 0x1f7   : > { %v595_v7 = vmul.f32 %v594_v2, %v1204_v57  ;;  %v596_v8 = vmul.f32 %v594_v2, %v1202_v56  ;;  %v516_v9 = vsub.f32 1.5, %v515_v4  ;;  %v527_v56 = vstv %s758_s29 }
 0x1f9   : > { %v599_v11 = vadd.f32 %v598_v6, %v595_v7  ;;  %v600_v12 = vadd.f32 %v598_v6, %v596_v8  ;;  %v517_v5 = vmul.f32 %v864_v54, %v516_v9 }
 0x1fb   : > { %v601_v13 = vmax.f32 %v599_v11, 0.0  ;;  %v602_v14 = vmax.f32 %v600_v12, 0.0  ;;  %v521_v15 = vsel %vm520_vm15, %v864_v54, %v517_v5 }
 0x1fc   : > { %v523_v16 = vmul.f32 %v522_v10, %v521_v15 }
 0x1fd   : > { %766 = vst [vmem:[%s1230_s28 + $0x20] sm:$0xff] %v601_v13 }
 0x1fe   : > { %767 = vst [vmem:[%s1230_s28 + $0x28] sm:$0xff] %v602_v14  ;;  %v524_v57 = vmul.f32 %v523_v16, %v1197_v52  ;;  %v525_v17 = vmul.f32 %v523_v16, %v1213_v63 }
 0x200   : > { %v528_v18 = vadd.f32 %v527_v56, %v524_v57  ;;  %v529_v3 = vadd.f32 %v527_v56, %v525_v17 }
 0x202   : > { %v530_v19 = vmax.f32 %v528_v18, 0.0  ;;  %v531_v20 = vmax.f32 %v529_v3, 0.0 }
 0x204   : > { %759 = vst [vmem:[%s1230_s28 + $0x10] sm:$0xff] %v530_v19 }
 0x205   : > { %760 = vst [vmem:[%s1230_s28 + $0x18] sm:$0xff] %v531_v20 }
 0x206   : > { %952 = shalt.err (!%p949_p8)
}
 0x207   : > { %s1007_s18 = smov 128   ;;  %s1008_s28 = smov 8  }
 0x208   : > { %791 = dma.vmem_to_hbm [thread:$0]  (%p1082_p5), %s620_s25, 768, %s622_s15, %s607_s9, %s1007_s18, %s1007_s18, %s1008_s28  }
 0x209 PF: > { %p818_p9 = scmp.ge.s32.totalorder %s999_s24, 2  ;;  %s636_s10 = sand.u32 1, %s987_s21  }
 0x20a   : > { %s637_s11 = scalar_lea.sflag [#allocation3], %s636_s10 }
 0x20b   : > { %p807_p10 = pnand %p818_p9, %p1086_p6 }
 0x20d   : > { %p808_p11 = pneg %p807_p10 }
 0x20f   : > { %982 = dma.done.wait (%p808_p11), %s637_s11, 768  }
 0x210   : > { %984 = vsyncadd (%p808_p11), %s637_s11, 4294966528  ;;  %p19_p12 = scmp.ge.s32.totalorder %s1069_s27, 4   ;;  %s1288_s21 = smov %s991_s22 }
 0x211   : > { %s1289_s22 = smov %s995_s23  ;;  %s1290_s23 = smov %s1080_s30 }
 0x212   : > { %s1291_s24 = smov %s1069_s27  ;;  %21 = sbr.rel (!%p19_p12) target bundleno = 6 (0x6), region = 101 }
 0x217   :  { %643 = vsyncpa [#allocation3], 1 }
 0x218   :  { %645 = vsyncpa [#allocation3 + $0x1], 1 }
 0x219   :  { %646 = vsyncpa [#allocation4], 1 }
 0x21a   :  { %648 = vsyncpa [#allocation4 + $0x1], 1 }
 0x21b   :  { %649 = vsyncpa [#allocation6], 1 }
 0x21c   :  { %650 = vsyncpa [#allocation9], 1 }

</bundles_post_ra>
